<compile_context>
chip_gen: v5e
topology: v5e:2x2
jax: 0.10.0
libtpu: 0.0.40
codegen_flags: <defaults>
</compile_context>

<pallas_src>
import jax
import jax.numpy as jnp
from jax.experimental import pallas as pl
from jax.experimental.pallas import tpu as pltpu

# ---- hyperparameters fixed by CharacterEmbedding.__init__ ----
EMB_DIM = 16
FILTERS = [(1, 32), (1, 32), (3, 64), (3, 128), (5, 256), (5, 512), (7, 1024)]
N_FILTERS = sum(n for _, n in FILTERS)          # 2048
N_HIGHWAY = 2
MAX_W = 7
WIN = MAX_W * EMB_DIM                           # 112
WIN_PAD = 128                                   # conv contraction padded to full MXU pass

# Highway tiling constants (2048 is divisible by both).
TN_HW = 512      # output tile per (nl, gate) pair -> 1024-wide fused lane-dense tile
TK_HW = 512      # reduction tile (1 MiB bf16 weight block per step)
MAX_TM = 256     # row tile (parallel axis)


def _round_up(x, m):
    return (x + m - 1) // m * m


def _pick_tm(M, max_tm=MAX_TM):
    return min(max_tm, _round_up(M, 8))


# ----------------------------------------------------------------------------
# Kernel 1: fused conv-as-matmul + bias + ReLU   (grid over M only, W resident)
# ----------------------------------------------------------------------------
def conv_relu_kernel(x_ref, w_ref, b_ref, o_ref):
    y = jnp.dot(x_ref[...], w_ref[...], preferred_element_type=jnp.float32)
    o_ref[...] = jnp.maximum(y + b_ref[...], 0.0).astype(o_ref.dtype)


def conv_relu(x_unf, w_big, b_big, *, tm):
    M, Kp = x_unf.shape
    N = w_big.shape[1]
    return pl.pallas_call(
        conv_relu_kernel,
        out_shape=jax.ShapeDtypeStruct((M, N), jnp.bfloat16),
        grid_spec=pltpu.PrefetchScalarGridSpec(
            num_scalar_prefetch=0,
            grid=(pl.cdiv(M, tm),),
            in_specs=[
                pl.BlockSpec((tm, Kp), lambda i: (i, 0)),
                pl.BlockSpec((Kp, N), lambda i: (0, 0)),   # resident weight (bf16)
                pl.BlockSpec((1, N), lambda i: (0, 0)),    # resident bias (f32)
            ],
            out_specs=pl.BlockSpec((tm, N), lambda i: (i, 0)),
        ),
        compiler_params=pltpu.CompilerParams(dimension_semantics=("parallel",)),
    )(x_unf, w_big, b_big)


# ----------------------------------------------------------------------------
# Kernel 2: one highway layer with fused (nonlinear | gate) matmul
#   acc[:, :tn]  -> nonlinear pre-activation,  acc[:, tn:] -> gate pre-activation
#   out = sigmoid(g)*x + (1-sigmoid(g))*relu(nl)
# ----------------------------------------------------------------------------
def highway_kernel(xk_ref, xj_ref, w_ref, b_ref, o_ref, acc_ref):
    k = pl.program_id(2)

    @pl.when(k == 0)
    def _():
        acc_ref[...] = jnp.zeros_like(acc_ref)

    acc_ref[...] += jnp.dot(xk_ref[...], w_ref[...],
                            preferred_element_type=jnp.float32)

    @pl.when(k == pl.num_programs(2) - 1)
    def _():
        tn = o_ref.shape[1]
        proj = acc_ref[...] + b_ref[...]
        nl = jnp.maximum(proj[:, :tn], 0.0)
        g = jax.nn.sigmoid(proj[:, tn:])
        x = xj_ref[...].astype(jnp.float32)
        o_ref[...] = (g * x + (1.0 - g) * nl).astype(o_ref.dtype)


def highway_layer(x, w_fused, b_fused, *, tm, tn=TN_HW, tk=TK_HW):
    M, D = x.shape
    assert D % tn == 0 and D % tk == 0, (D, tn, tk)
    return pl.pallas_call(
        highway_kernel,
        out_shape=jax.ShapeDtypeStruct((M, D), jnp.bfloat16),
        grid_spec=pltpu.PrefetchScalarGridSpec(
            num_scalar_prefetch=0,
            grid=(pl.cdiv(M, tm), D // tn, D // tk),
            in_specs=[
                pl.BlockSpec((tm, tk), lambda i, j, k: (i, k)),       # x reduction slice
                pl.BlockSpec((tm, tn), lambda i, j, k: (i, j)),       # x carry slice (no re-DMA over k)
                pl.BlockSpec((tk, 2 * tn), lambda i, j, k: (k, j)),   # fused [Wnl|Wg] tile
                pl.BlockSpec((1, 2 * tn), lambda i, j, k: (0, j)),    # fused bias (f32)
            ],
            out_specs=pl.BlockSpec((tm, tn), lambda i, j, k: (i, j)),
            scratch_shapes=[pltpu.VMEM((tm, 2 * tn), jnp.float32)],
        ),
        compiler_params=pltpu.CompilerParams(
            dimension_semantics=("parallel", "parallel", "arbitrary")),
    )(x, x, w_fused, b_fused)


# ----------------------------------------------------------------------------
# Kernel 3: final projection Linear(n_filters -> output_dim), weight resident
# ----------------------------------------------------------------------------
def proj_kernel(x_ref, w_ref, b_ref, o_ref):
    y = jnp.dot(x_ref[...], w_ref[...], preferred_element_type=jnp.float32)
    o_ref[...] = y + b_ref[...]


def projection(x, w, b, *, tm):
    M, D = x.shape
    N = w.shape[1]
    return pl.pallas_call(
        proj_kernel,
        out_shape=jax.ShapeDtypeStruct((M, N), jnp.float32),
        grid_spec=pltpu.PrefetchScalarGridSpec(
            num_scalar_prefetch=0,
            grid=(pl.cdiv(M, tm),),
            in_specs=[
                pl.BlockSpec((tm, D), lambda i: (i, 0)),
                pl.BlockSpec((D, N), lambda i: (0, 0)),   # resident weight (bf16)
                pl.BlockSpec((1, N), lambda i: (0, 0)),   # resident bias (f32)
            ],
            out_specs=pl.BlockSpec((tm, N), lambda i: (i, 0)),
        ),
        compiler_params=pltpu.CompilerParams(dimension_semantics=("parallel",)),
    )(x, w, b)


# ----------------------------------------------------------------------------
# Forward pass (glue in plain JAX, hot paths in Pallas)
# ----------------------------------------------------------------------------
def character_embedding_forward(input_ids, params, *, max_tm=MAX_TM):
    B, L = input_ids.shape
    # TODO(synk): nn.Embedding gather stays in plain JAX (table lookup, no dense kernel).
    x = params["embedding"][input_ids]                      # (B, L, EMB_DIM) f32
    # unfold: zero-padded 7-wide centered window per token.
    half = MAX_W // 2
    xp = jnp.pad(x, ((0, 0), (half, half), (0, 0)))
    x_unf = jnp.concatenate([xp[:, p:p + L, :] for p in range(MAX_W)], axis=-1)
    M = B * L
    x_unf = x_unf.reshape(M, WIN)

    tm = _pick_tm(M, max_tm)
    M_pad = _round_up(M, tm)
    # pad rows to a tile multiple and the contraction dim 112 -> 128; cast to bf16.
    x_unf = jnp.pad(x_unf, ((0, M_pad - M), (0, WIN_PAD - WIN))).astype(jnp.bfloat16)

    t = conv_relu(x_unf, params["conv_w_big"], params["conv_b_big"], tm=tm)   # (M_pad, 2048) bf16
    for (w_f, b_f) in params["highway_fused"]:
        t = highway_layer(t, w_f, b_f, tm=tm)                                 # (M_pad, 2048) bf16
    out = projection(t, params["proj_w"], params["proj_b"], tm=tm)            # (M_pad, out) f32
    return out[:M].reshape(B, L, -1)


# ----------------------------------------------------------------------------
# Parameter init (matches the PyTorch module's shapes) + Pallas-layout prep
# ----------------------------------------------------------------------------
def _fuse_highway(w_nl, w_g, b_nl, b_g, tn):
    """Interleave [nl tile j | gate tile j] so one (tk, 2*tn) block feeds one dot."""
    K, N = w_nl.shape
    nt = N // tn
    w_f = jnp.stack([w_nl.reshape(K, nt, tn), w_g.reshape(K, nt, tn)], axis=2)
    w_f = w_f.reshape(K, 2 * N)
    b_f = jnp.stack([b_nl.reshape(nt, tn), b_g.reshape(nt, tn)], axis=1)
    b_f = b_f.reshape(1, 2 * N)
    return w_f, b_f


def init_params(key, vocab_dim, output_dim):
    keys = iter(jax.random.split(key, 32))
    params = {}
    params["embedding"] = (
        jax.random.normal(next(keys), (vocab_dim, EMB_DIM), jnp.float32) * 0.5)

    # Conv1d weights (out, in, width) packed into one block-sparse (128, 2048) matrix.
    conv_raw = []
    w_big = jnp.zeros((WIN_PAD, N_FILTERS), jnp.float32)    # rows 112..127 stay zero
    b_big = jnp.zeros((N_FILTERS,), jnp.float32)
    col = 0
    for width, num in FILTERS:
        wk = jax.random.normal(next(keys), (num, EMB_DIM, width), jnp.float32) * 0.1
        bk = jax.random.normal(next(keys), (num,), jnp.float32) * 0.1
        conv_raw.append((wk, bk))
        pad = (width - 1) // 2
        for kk in range(width):
            p = kk + MAX_W // 2 - pad        # position inside the 7-wide window
            w_big = w_big.at[p * EMB_DIM:(p + 1) * EMB_DIM, col:col + num].set(
                wk[:, :, kk].T)
        b_big = b_big.at[col:col + num].set(bk)
        col += num
    params["conv_raw"] = conv_raw
    params["conv_w_big"] = w_big.astype(jnp.bfloat16)
    params["conv_b_big"] = b_big.reshape(1, N_FILTERS)                  # f32 bias

    # Highway: nn.Linear(2048, 4096) per layer; gate bias init = 1 (per _init_highway).
    hw_raw, hw_fused = [], []
    for _ in range(N_HIGHWAY):
        wh = jax.random.normal(next(keys), (2 * N_FILTERS, N_FILTERS),
                               jnp.float32) * 0.02
        bh = jnp.zeros((2 * N_FILTERS,), jnp.float32).at[N_FILTERS:].set(1.0)
        hw_raw.append((wh, bh))
        w_f, b_f = _fuse_highway(wh[:N_FILTERS].T, wh[N_FILTERS:].T,
                                 bh[:N_FILTERS], bh[N_FILTERS:], TN_HW)
        hw_fused.append((w_f.astype(jnp.bfloat16), b_f))                # f32 bias
    params["highway_raw"] = hw_raw
    params["highway_fused"] = hw_fused

    # Projection: nn.Linear(2048, output_dim)
    wp = jax.random.normal(next(keys), (output_dim, N_FILTERS), jnp.float32) * 0.02
    bp = jax.random.normal(next(keys), (output_dim,), jnp.float32) * 0.1
    params["proj_raw"] = (wp, bp)
    params["proj_w"] = wp.T.astype(jnp.bfloat16)
    params["proj_b"] = bp.reshape(1, -1)                                # f32 bias
    return params


# ----------------------------------------------------------------------------
# Pure-JAX reference (mirrors the PyTorch forward exactly, all f32)
# ----------------------------------------------------------------------------
def reference_forward(input_ids, params):
    x = params["embedding"][input_ids]                      # (B, L, E)
    xc = jnp.transpose(x, (0, 2, 1))                        # NCW, like torch
    outs = []
    for (wk, bk), (width, _) in zip(params["conv_raw"], FILTERS):
        pad = (width - 1) // 2
        y = jax.lax.conv_general_dilated(
            xc, wk, window_strides=(1,), padding=[(pad, pad)],
            dimension_numbers=("NCH", "OIH", "NCH"))
        y = jnp.maximum(y + bk[None, :, None], 0.0)
        outs.append(jnp.transpose(y, (0, 2, 1)))
    t = jnp.concatenate(outs, axis=-1)                      # (B, L, 2048)
    for wh, bh in params["highway_raw"]:
        prj = t @ wh.T + bh
        nl, g = prj[..., :N_FILTERS], prj[..., N_FILTERS:]
        t = jax.nn.sigmoid(g) * t + (1.0 - jax.nn.sigmoid(g)) * jnp.maximum(nl, 0.0)
    wp, bp = params["proj_raw"]
    return t @ wp.T + bp


if __name__ == "__main__":
    key = jax.random.PRNGKey(0)
    k_param, k_ids = jax.random.split(key)

    B, L = 2, 8
    vocab_dim, output_dim = 1000, 128

    params = init_params(k_param, vocab_dim, output_dim)
    input_ids = jax.random.randint(k_ids, (B, L), 0, vocab_dim)

    out = character_embedding_forward(input_ids, params)
    out = jax.block_until_ready(out)

    ref = reference_forward(input_ids, params)
    assert out.shape == (B, L, output_dim), out.shape
    max_err = float(jnp.max(jnp.abs(out - ref)))
    assert jnp.allclose(out, ref, atol=5e-2, rtol=5e-2), max_err

    print("KERNEL_OK")
</pallas_src>

<mosaic_0001>
module attributes {stable_mosaic.version = 11 : i64} {
  func.func @conv_relu_kernel(%arg0: i32, %arg1: memref<16x128xbf16, #tpu.memory_space<vmem>>, %arg2: memref<128x2048xbf16, #tpu.memory_space<vmem>>, %arg3: memref<1x2048xf32, #tpu.memory_space<vmem>>, %arg4: memref<16x2048xbf16, #tpu.memory_space<vmem>>) attributes {dimension_semantics = [#tpu.dimension_semantics<parallel>], iteration_bounds = array<i64: 1>, scalar_prefetch = 0 : i64, scratch_operands = 0 : i64, tpu.core_type = #tpu.core_type<tc>, window_params = [{transform_indices = @transform_0, window_bounds = array<i64: 16, 128>}, {pipeline_mode = #tpu.pipeline_mode<synchronous>, transform_indices = @transform_1, window_bounds = array<i64: 128, 2048>}, {pipeline_mode = #tpu.pipeline_mode<synchronous>, transform_indices = @transform_2, window_bounds = array<i64: 1, 2048>}, {transform_indices = @transform_3, window_bounds = array<i64: 16, 2048>}]} {
    %c0 = arith.constant 0 : index
    %c0_0 = arith.constant 0 : index
    %0 = vector.load %arg1[%c0, %c0_0] : memref<16x128xbf16, #tpu.memory_space<vmem>>, vector<16x128xbf16>
    %c0_1 = arith.constant 0 : index
    %c0_2 = arith.constant 0 : index
    %1 = vector.load %arg2[%c0_1, %c0_2] : memref<128x2048xbf16, #tpu.memory_space<vmem>>, vector<128x2048xbf16>
    %cst = arith.constant dense<0.000000e+00> : vector<16x2048xf32>
    %2 = tpu.matmul %0, %1, %cst {dimension_numbers = #tpu.dot_dimension_numbers<[1], [0], [0], [1], [0, 0, 1, 1], [], []>} : vector<16x128xbf16>, vector<128x2048xbf16>, vector<16x2048xf32> -> vector<16x2048xf32>
    %c0_3 = arith.constant 0 : index
    %c0_4 = arith.constant 0 : index
    %3 = vector.load %arg3[%c0_3, %c0_4] : memref<1x2048xf32, #tpu.memory_space<vmem>>, vector<1x2048xf32>
    %4 = vector.broadcast %3 : vector<1x2048xf32> to vector<16x2048xf32>
    %5 = arith.addf %2, %4 : vector<16x2048xf32>
    %cst_5 = arith.constant 0.000000e+00 : f32
    %6 = vector.broadcast %cst_5 : f32 to vector<16x2048xf32>
    %7 = arith.maximumf %5, %6 : vector<16x2048xf32>
    %8 = arith.truncf %7 : vector<16x2048xf32> to vector<16x2048xbf16>
    %c0_6 = arith.constant 0 : index
    %c0_7 = arith.constant 0 : index
    %9 = vector.load %arg4[%c0_6, %c0_7] : memref<16x2048xbf16, #tpu.memory_space<vmem>>, vector<16x2048xbf16>
    tpu.vector_store %arg4[%c0_6, %c0_7], %8 {strides = array<i32>} : memref<16x2048xbf16, #tpu.memory_space<vmem>>, vector<16x2048xbf16>,
    return
  }
  func.func @transform_0(%arg0: i32) -> (i32, i32) {
    %c0_i32 = arith.constant 0 : i32
    %c0_i32_0 = arith.constant 0 : i32
    return %arg0, %c0_i32 : i32, i32
  }
  func.func @transform_1(%arg0: i32) -> (i32, i32) {
    %c0_i32 = arith.constant 0 : i32
    %c0_i32_0 = arith.constant 0 : i32
    %c0_i32_1 = arith.constant 0 : i32
    return %c0_i32, %c0_i32_0 : i32, i32
  }
  func.func @transform_2(%arg0: i32) -> (i32, i32) {
    %c0_i32 = arith.constant 0 : i32
    %c0_i32_0 = arith.constant 0 : i32
    %c0_i32_1 = arith.constant 0 : i32
    return %c0_i32, %c0_i32_0 : i32, i32
  }
  func.func @transform_3(%arg0: i32) -> (i32, i32) {
    %c0_i32 = arith.constant 0 : i32
    %c0_i32_0 = arith.constant 0 : i32
    return %arg0, %c0_i32 : i32, i32
  }
}

</mosaic_0001>

<bundles_post_ra>
// kernel: tpu_custom_call.1
= control target key start
LH: loop header
LB: loop body
LE: loop exit
PB: predicated region body
PF: predicated region fallthrough
CT: control target
= control target key end

     0   :  { %8 = vsyncpa [#allocation3], 0  ;;  %s2019_s0 = inlined_call_operand.hbm [shape: bf16[16,128], index: 0, kind: input, shape index: {}]   ;;  %s2020_s1 = inlined_call_operand.hbm [shape: bf16[128,2048], index: 1, kind: input, shape index: {}]   ;;  %s2021_s2 = inlined_call_operand.hbm [shape: f32[1,2048], index: 2, kind: input, shape index: {}]   ;;  %s2022_s3 = inlined_call_operand.hbm [shape: bf16[16,2048], index: 3, kind: output, shape index: {}]  }
   0x1   :  { %9 = vsyncpa [#allocation6], 0  ;;  %s28_s14 = sshll.u32 %s2020_s1, 4  ;;  %s29_s14 = int_to_ptr.hbm [resolvable:$true] %s28_s14 }
   0x2   :  { %10 = vsyncpa [#allocation4], 0  ;;  %s1934_s15 = smov [#allocation5]   ;;  %s15_s19 = sshll.u32 %s2019_s0, 4  ;;  %s16_s19 = int_to_ptr.hbm [resolvable:$true] %s15_s19 }
   0x3   :  { %s30_s16 = sshll.u32 %s1934_s15, 4  ;;  %s1935_s20 = smov 1024   ;;  %s31_s16 = int_to_ptr.vmem [resolvable:$true] %s30_s16 }
   0x4   :  { %s1936_s21 = smov 64   ;;  %s1937_s22 = smov [#allocation2]  }
   0x5   :  { %36 = dma.hbm_to_vmem [thread:$0]  %s29_s14, 16384, %s31_s16, [#allocation6], %s1935_s20, %s1935_s20, %s1936_s21  }
   0x6   :  { %s17_s23 = sshll.u32 %s1937_s22, 4  ;;  %s42_s25 = sshll.u32 %s2021_s2, 4  ;;  %s18_s23 = int_to_ptr.vmem [resolvable:$true] %s17_s23  ;;  %s43_s25 = int_to_ptr.hbm [resolvable:$true] %s42_s25 }
   0x7   :  { %s1938_s26 = smov 4   ;;  %s1939_s0 = smov [#allocation7]  }
   0x8   :  { %23 = dma.hbm_to_vmem [thread:$0]  %s16_s19, 128, %s18_s23, [#allocation3], %s1936_s21, %s1936_s21, %s1938_s26  }
   0x9   :  { %s44_s27 = sshll.u32 %s1939_s0, 4  ;;  %s45_s27 = int_to_ptr.vmem [resolvable:$true] %s44_s27 }
   0xa   :  { %47 = dma.hbm_to_vmem [thread:$0]  %s43_s25, 256, %s45_s27, [#allocation6]  }
   0xb   :  { %1928 = dma.done.wait [#allocation3], 128  }
   0xc   :  { %1929 = vsyncadd [#allocation3], 4294967168 }
   0xd   :  { %1930 = dma.done.wait [#allocation6], 16640  }
   0xe   :  { %1931 = vsyncadd [#allocation6], 4294950656  ;;  %v1634_v0 = vld [vmem:[#allocation5 + $0x380] sm:$0xf]  ;;  %v1809_v2 = vld [vmem:[#allocation5 + $0x384] sm:$0xf] }
   0xf   :  { %v1817_v1 = vld [vmem:[#allocation5 + $0x3bc] sm:$0xf0]  ;;  %v1636_v4 = vld [vmem:[#allocation5 + $0x3c0] sm:$0xf0]  ;;  %v1642_v5 = vld [vmem:[#allocation5 + $0x388] sm:$0xf] }
  0x10   :  { %v1635_v3 = vor.u32 %v1817_v1, %v1634_v0  ;;  %v1818_v6 = vld [vmem:[#allocation5 + $0x3c4] sm:$0xf0]  ;;  %v1639_v7 = vor.u32 %v1809_v2, %v1636_v4  ;;  %v1810_v9 = vld [vmem:[#allocation5 + $0x38c] sm:$0xf]  ;;  %v1570_v11 = vld [vmem:[#allocation5 + $0x300] sm:$0xf] }
  0x11   :  { %v1643_v8 = vor.u32 %v1818_v6, %v1642_v5  ;;  %v1644_v10 = vld [vmem:[#allocation5 + $0x3c8] sm:$0xf0]  ;;  %v1801_v13 = vld [vmem:[#allocation5 + $0x33c] sm:$0xf0]  ;;  %v1793_v14 = vld [vmem:[#allocation5 + $0x304] sm:$0xf] }
  0x12   :  { %872 = vmatpush.bf16.msra.mxu0 %v1635_v3  ;;  %v1647_v12 = vor.u32 %v1810_v9, %v1644_v10  ;;  %v1572_v15 = vld [vmem:[#allocation5 + $0x340] sm:$0xf0]  ;;  %886 = vmatpush.bf16.msra.mxu1 %v1639_v7  ;;  %v1571_v16 = vor.u32 %v1801_v13, %v1570_v11  ;;  %v1578_v18 = vld [vmem:[#allocation5 + $0x308] sm:$0xf]  ;;  %v1794_v20 = vld [vmem:[#allocation5 + $0x30c] sm:$0xf] }
  0x13   :  { %900 = vmatpush.bf16.msra.mxu2 %v1643_v8  ;;  %v1575_v17 = vor.u32 %v1793_v14, %v1572_v15  ;;  %v1802_v19 = vld [vmem:[#allocation5 + $0x344] sm:$0xf0]  ;;  %v1580_v22 = vld [vmem:[#allocation5 + $0x348] sm:$0xf0]  ;;  %v1506_v23 = vld [vmem:[#allocation5 + $0x280] sm:$0xf] }
  0x14   :  { %914 = vmatpush.bf16.msra.mxu3 %v1647_v12  ;;  %v1579_v21 = vor.u32 %v1802_v19, %v1578_v18  ;;  %v1785_v24 = vld [vmem:[#allocation5 + $0x2bc] sm:$0xf0]  ;;  %v1583_v25 = vor.u32 %v1794_v20, %v1580_v22  ;;  %v1777_v26 = vld [vmem:[#allocation5 + $0x284] sm:$0xf]  ;;  %v1514_v28 = vld [vmem:[#allocation5 + $0x288] sm:$0xf] }
  0x15   :  { %v1508_v27 = vld [vmem:[#allocation5 + $0x2c0] sm:$0xf0]  ;;  %v1507_v29 = vor.u32 %v1785_v24, %v1506_v23  ;;  %v1786_v30 = vld [vmem:[#allocation5 + $0x2c4] sm:$0xf0]  ;;  %v1778_v31 = vld [vmem:[#allocation5 + $0x28c] sm:$0xf] }
  0x16   :  { %873 = vmatpush.bf16.msra.mxu0 %v1571_v16  ;;  %v1516_v32 = vld [vmem:[#allocation5 + $0x2c8] sm:$0xf0]  ;;  %887 = vmatpush.bf16.msra.mxu1 %v1575_v17  ;;  %v1511_v33 = vor.u32 %v1777_v26, %v1508_v27  ;;  %v1515_v34 = vor.u32 %v1786_v30, %v1514_v28  ;;  %v1442_v35 = vld [vmem:[#allocation5 + $0x200] sm:$0xf]  ;;  %v1761_v37 = vld [vmem:[#allocation5 + $0x204] sm:$0xf] }
  0x17   :  { %901 = vmatpush.bf16.msra.mxu2 %v1579_v21  ;;  %v1769_v36 = vld [vmem:[#allocation5 + $0x23c] sm:$0xf0]  ;;  %v1519_v38 = vor.u32 %v1778_v31, %v1516_v32  ;;  %v1444_v39 = vld [vmem:[#allocation5 + $0x240] sm:$0xf0]  ;;  %v1450_v40 = vld [vmem:[#allocation5 + $0x208] sm:$0xf] }
  0x18   :  { %915 = vmatpush.bf16.msra.mxu3 %v1583_v25  ;;  %v1770_v41 = vld [vmem:[#allocation5 + $0x244] sm:$0xf0]  ;;  %v1762_v42 = vld [vmem:[#allocation5 + $0x20c] sm:$0xf]  ;;  %v1443_v44 = vor.u32 %v1769_v36, %v1442_v35  ;;  %v1447_v45 = vor.u32 %v1761_v37, %v1444_v39  ;;  %v1378_v47 = vld [vmem:[#allocation5 + $0x180] sm:$0xf] }
  0x19   :  { %v1452_v43 = vld [vmem:[#allocation5 + $0x248] sm:$0xf0]  ;;  %v1451_v46 = vor.u32 %v1770_v41, %v1450_v40  ;;  %v1753_v48 = vld [vmem:[#allocation5 + $0x1bc] sm:$0xf0]  ;;  %v1745_v49 = vld [vmem:[#allocation5 + $0x184] sm:$0xf] }
  0x1a   :  { %874 = vmatpush.bf16.msra.mxu0 %v1507_v29  ;;  %888 = vmatpush.bf16.msra.mxu1 %v1511_v33  ;;  %v1455_v50 = vor.u32 %v1762_v42, %v1452_v43  ;;  %v1380_v51 = vld [vmem:[#allocation5 + $0x1c0] sm:$0xf0]  ;;  %v1386_v52 = vld [vmem:[#allocation5 + $0x188] sm:$0xf]  ;;  %v1746_v54 = vld [vmem:[#allocation5 + $0x18c] sm:$0xf]  ;;  %v1379_v56 = vor.u32 %v1753_v48, %v1378_v47 }
  0x1b   :  { %902 = vmatpush.bf16.msra.mxu2 %v1515_v34  ;;  %v1754_v53 = vld [vmem:[#allocation5 + $0x1c4] sm:$0xf0]  ;;  %v1388_v55 = vld [vmem:[#allocation5 + $0x1c8] sm:$0xf0]  ;;  %v1383_v57 = vor.u32 %v1745_v49, %v1380_v51  ;;  %v1314_v59 = vld [vmem:[#allocation5 + $0x100] sm:$0xf] }
  0x1c   :  { %916 = vmatpush.bf16.msra.mxu3 %v1519_v38  ;;  %v1387_v58 = vor.u32 %v1754_v53, %v1386_v52  ;;  %v1737_v60 = vld [vmem:[#allocation5 + $0x13c] sm:$0xf0]  ;;  %v1729_v61 = vld [vmem:[#allocation5 + $0x104] sm:$0xf]  ;;  %v1391_v62 = vor.u32 %v1746_v54, %v1388_v55  ;;  %v1322_v0 = vld [vmem:[#allocation5 + $0x108] sm:$0xf] }
  0x1d   :  { %v1316_v63 = vld [vmem:[#allocation5 + $0x140] sm:$0xf0]  ;;  %v1738_v1 = vld [vmem:[#allocation5 + $0x144] sm:$0xf0]  ;;  %v1730_v2 = vld [vmem:[#allocation5 + $0x10c] sm:$0xf]  ;;  %v1315_v4 = vor.u32 %v1737_v60, %v1314_v59 }
  0x1e   :  { %875 = vmatpush.bf16.msra.mxu0 %v1443_v44  ;;  %889 = vmatpush.bf16.msra.mxu1 %v1447_v45  ;;  %v1324_v3 = vld [vmem:[#allocation5 + $0x148] sm:$0xf0]  ;;  %v1319_v5 = vor.u32 %v1729_v61, %v1316_v63  ;;  %v1323_v6 = vor.u32 %v1738_v1, %v1322_v0  ;;  %v1250_v7 = vld [vmem:[#allocation5 + $0x80] sm:$0xf]  ;;  %v1713_v9 = vld [vmem:[#allocation5 + $0x84] sm:$0xf] }
  0x1f   :  { %903 = vmatpush.bf16.msra.mxu2 %v1451_v46  ;;  %v1721_v8 = vld [vmem:[#allocation5 + $0xbc] sm:$0xf0]  ;;  %v1327_v10 = vor.u32 %v1730_v2, %v1324_v3  ;;  %v1252_v11 = vld [vmem:[#allocation5 + $0xc0] sm:$0xf0]  ;;  %v1258_v12 = vld [vmem:[#allocation5 + $0x88] sm:$0xf] }
  0x20   :  { %917 = vmatpush.bf16.msra.mxu3 %v1455_v50  ;;  %v1722_v13 = vld [vmem:[#allocation5 + $0xc4] sm:$0xf0]  ;;  %v1714_v14 = vld [vmem:[#allocation5 + $0x8c] sm:$0xf]  ;;  %v1251_v16 = vor.u32 %v1721_v8, %v1250_v7  ;;  %v1186_v17 = vld [vmem:[#allocation5] sm:$0xf]  ;;  %v1255_v19 = vor.u32 %v1713_v9, %v1252_v11 }
  0x21   :  { %v1260_v15 = vld [vmem:[#allocation5 + $0xc8] sm:$0xf0]  ;;  %v1705_v18 = vld [vmem:[#allocation5 + $0x3c] sm:$0xf0]  ;;  %v1259_v20 = vor.u32 %v1722_v13, %v1258_v12  ;;  %v1697_v21 = vld [vmem:[#allocation5 + $0x4] sm:$0xf] }
  0x22   :  { %876 = vmatpush.bf16.msra.mxu0 %v1379_v56  ;;  %890 = vmatpush.bf16.msra.mxu1 %v1383_v57  ;;  %v1188_v22 = vld [vmem:[#allocation5 + $0x40] sm:$0xf0]  ;;  %v1194_v23 = vld [vmem:[#allocation5 + $0x8] sm:$0xf]  ;;  %v1263_v24 = vor.u32 %v1714_v14, %v1260_v15  ;;  %v1698_v26 = vld [vmem:[#allocation5 + $0xc] sm:$0xf]  ;;  %v1187_v31 = vor.u32 %v1705_v18, %v1186_v17 }
  0x23   :  { %904 = vmatpush.bf16.msra.mxu2 %v1387_v58  ;;  %v1706_v25 = vld [vmem:[#allocation5 + $0x44] sm:$0xf0]  ;;  %v1196_v27 = vld [vmem:[#allocation5 + $0x48] sm:$0xf0]  ;;  %v1650_v28 = vld [vmem:[#allocation5 + $0x390] sm:$0xf]  ;;  %v1191_v35 = vor.u32 %v1697_v21, %v1188_v22 }
  0x24   :  { %918 = vmatpush.bf16.msra.mxu3 %v1391_v62  ;;  %v1819_v29 = vld [vmem:[#allocation5 + $0x3cc] sm:$0xf0]  ;;  %v1811_v30 = vld [vmem:[#allocation5 + $0x394] sm:$0xf]  ;;  %v1658_v33 = vld [vmem:[#allocation5 + $0x398] sm:$0xf]  ;;  %v1195_v36 = vor.u32 %v1706_v25, %v1194_v23  ;;  %v1199_v39 = vor.u32 %v1698_v26, %v1196_v27 }
  0x25   :  { %v1652_v32 = vld [vmem:[#allocation5 + $0x3d0] sm:$0xf0]  ;;  %v1820_v34 = vld [vmem:[#allocation5 + $0x3d4] sm:$0xf0]  ;;  %v1812_v37 = vld [vmem:[#allocation5 + $0x39c] sm:$0xf]  ;;  %v1651_v40 = vor.u32 %v1819_v29, %v1650_v28 }
  0x26   :  { %877 = vmatpush.bf16.msra.mxu0 %v1315_v4  ;;  %891 = vmatpush.bf16.msra.mxu1 %v1319_v5  ;;  %v1660_v38 = vld [vmem:[#allocation5 + $0x3d8] sm:$0xf0]  ;;  %v1655_v41 = vor.u32 %v1811_v30, %v1652_v32  ;;  %v1659_v42 = vor.u32 %v1820_v34, %v1658_v33  ;;  %v1586_v43 = vld [vmem:[#allocation5 + $0x310] sm:$0xf]  ;;  %v1795_v45 = vld [vmem:[#allocation5 + $0x314] sm:$0xf] }
  0x27   :  { %905 = vmatpush.bf16.msra.mxu2 %v1323_v6  ;;  %v1803_v44 = vld [vmem:[#allocation5 + $0x34c] sm:$0xf0]  ;;  %v1663_v46 = vor.u32 %v1812_v37, %v1660_v38  ;;  %v1588_v47 = vld [vmem:[#allocation5 + $0x350] sm:$0xf0]  ;;  %v1594_v48 = vld [vmem:[#allocation5 + $0x318] sm:$0xf] }
  0x28   :  { %919 = vmatpush.bf16.msra.mxu3 %v1327_v10  ;;  %v1804_v49 = vld [vmem:[#allocation5 + $0x354] sm:$0xf0]  ;;  %v1796_v50 = vld [vmem:[#allocation5 + $0x31c] sm:$0xf]  ;;  %v1587_v52 = vor.u32 %v1803_v44, %v1586_v43  ;;  %v1591_v53 = vor.u32 %v1795_v45, %v1588_v47  ;;  %v1522_v55 = vld [vmem:[#allocation5 + $0x290] sm:$0xf] }
  0x29   :  { %v1596_v51 = vld [vmem:[#allocation5 + $0x358] sm:$0xf0]  ;;  %v1595_v54 = vor.u32 %v1804_v49, %v1594_v48  ;;  %v1787_v56 = vld [vmem:[#allocation5 + $0x2cc] sm:$0xf0]  ;;  %v1779_v57 = vld [vmem:[#allocation5 + $0x294] sm:$0xf] }
  0x2a   :  { %878 = vmatpush.bf16.msra.mxu0 %v1251_v16  ;;  %892 = vmatpush.bf16.msra.mxu1 %v1255_v19  ;;  %v1599_v58 = vor.u32 %v1796_v50, %v1596_v51  ;;  %v1524_v59 = vld [vmem:[#allocation5 + $0x2d0] sm:$0xf0]  ;;  %v1530_v60 = vld [vmem:[#allocation5 + $0x298] sm:$0xf]  ;;  %v1780_v62 = vld [vmem:[#allocation5 + $0x29c] sm:$0xf]  ;;  %v1523_v0 = vor.u32 %v1787_v56, %v1522_v55 }
  0x2b   :  { %906 = vmatpush.bf16.msra.mxu2 %v1259_v20  ;;  %v1788_v61 = vld [vmem:[#allocation5 + $0x2d4] sm:$0xf0]  ;;  %v1532_v63 = vld [vmem:[#allocation5 + $0x2d8] sm:$0xf0]  ;;  %v1527_v2 = vor.u32 %v1779_v57, %v1524_v59  ;;  %v1458_v4 = vld [vmem:[#allocation5 + $0x210] sm:$0xf] }
  0x2c   :  { %920 = vmatpush.bf16.msra.mxu3 %v1263_v24  ;;  %v1975_v1 = vld [vmem:[#allocation2] sm:$0xff]  ;;  %v1531_v3 = vor.u32 %v1788_v61, %v1530_v60  ;;  %v1771_v5 = vld [vmem:[#allocation5 + $0x24c] sm:$0xf0]  ;;  %v1763_v6 = vld [vmem:[#allocation5 + $0x214] sm:$0xf]  ;;  %v1535_v7 = vor.u32 %v1780_v62, %v1532_v63  ;;  %s1940_s2 = smov [#allocation8]  }
  0x2d   :  { %v1460_v8 = vld [vmem:[#allocation5 + $0x250] sm:$0xf0]  ;;  %v1466_v9 = vld [vmem:[#allocation5 + $0x218] sm:$0xf]  ;;  %v1764_v11 = vld [vmem:[#allocation5 + $0x21c] sm:$0xf]  ;;  %v1459_v13 = vor.u32 %v1771_v5, %v1458_v4 }
  0x2e   :  { %879 = vmatpush.bf16.msra.mxu0 %v1187_v31  ;;  %893 = vmatpush.bf16.msra.mxu1 %v1191_v35  ;;  %v1772_v10 = vld [vmem:[#allocation5 + $0x254] sm:$0xf0]  ;;  %v1468_v12 = vld [vmem:[#allocation5 + $0x258] sm:$0xf0]  ;;  %v1463_v14 = vor.u32 %v1763_v6, %v1460_v8  ;;  %v1394_v16 = vld [vmem:[#allocation5 + $0x190] sm:$0xf] }
  0x2f   :  { %907 = vmatpush.bf16.msra.mxu2 %v1195_v36  ;;  %v1467_v15 = vor.u32 %v1772_v10, %v1466_v9  ;;  %v1755_v17 = vld [vmem:[#allocation5 + $0x1cc] sm:$0xf0]  ;;  %v1747_v18 = vld [vmem:[#allocation5 + $0x194] sm:$0xf]  ;;  %v1471_v19 = vor.u32 %v1764_v11, %v1468_v12  ;;  %v1402_v21 = vld [vmem:[#allocation5 + $0x198] sm:$0xf] }
  0x30   :  { %921 = vmatpush.bf16.msra.mxu3 %v1199_v39  ;;  %v1396_v20 = vld [vmem:[#allocation5 + $0x1d0] sm:$0xf0]  ;;  %v1756_v22 = vld [vmem:[#allocation5 + $0x1d4] sm:$0xf0]  ;;  %v1748_v23 = vld [vmem:[#allocation5 + $0x19c] sm:$0xf]  ;;  %v1395_v25 = vor.u32 %v1755_v17, %v1394_v16 }
  0x31   :  { %880 = vmatmul.bf16.vlgmr.msra.gmra.mxu0 %v1975_v1  ;;  %894 = vmatmul.bf16.vlgmr.msra.gmra.mxu1 %v1975_v1  ;;  %v1404_v24 = vld [vmem:[#allocation5 + $0x1d8] sm:$0xf0]  ;;  %v1399_v26 = vor.u32 %v1747_v18, %v1396_v20  ;;  %v1403_v27 = vor.u32 %v1756_v22, %v1402_v21  ;;  %v1330_v28 = vld [vmem:[#allocation5 + $0x110] sm:$0xf]  ;;  %v1731_v30 = vld [vmem:[#allocation5 + $0x114] sm:$0xf] }
  0x32   :  { %928 = vmatpush.bf16.msrb.mxu0 %v1651_v40  ;;  %942 = vmatpush.bf16.msrb.mxu1 %v1655_v41  ;;  %v1739_v29 = vld [vmem:[#allocation5 + $0x14c] sm:$0xf0]  ;;  %v1407_v31 = vor.u32 %v1748_v23, %v1404_v24  ;;  %v1332_v32 = vld [vmem:[#allocation5 + $0x150] sm:$0xf0]  ;;  %v1338_v33 = vld [vmem:[#allocation5 + $0x118] sm:$0xf] }
  0x33   :  { %956 = vmatpush.bf16.msrb.mxu2 %v1659_v42  ;;  %922 = vmatmul.bf16.vlgmr.msra.gmra.mxu3 %v1975_v1  ;;  %v1740_v34 = vld [vmem:[#allocation5 + $0x154] sm:$0xf0]  ;;  %v1732_v35 = vld [vmem:[#allocation5 + $0x11c] sm:$0xf]  ;;  %v1331_v37 = vor.u32 %v1739_v29, %v1330_v28  ;;  %v1335_v38 = vor.u32 %v1731_v30, %v1332_v32  ;;  %v1266_v40 = vld [vmem:[#allocation5 + $0x90] sm:$0xf] }
  0x34   :  { %970 = vmatpush.bf16.msrb.mxu3 %v1663_v46  ;;  %908 = vmatmul.bf16.vlgmr.msra.gmra.mxu2 %v1975_v1  ;;  %v1340_v36 = vld [vmem:[#allocation5 + $0x158] sm:$0xf0]  ;;  %v1339_v39 = vor.u32 %v1740_v34, %v1338_v33  ;;  %v1723_v41 = vld [vmem:[#allocation5 + $0xcc] sm:$0xf0]  ;;  %v1715_v42 = vld [vmem:[#allocation5 + $0x94] sm:$0xf] }
  0x35   :  { %v1343_v43 = vor.u32 %v1732_v35, %v1340_v36  ;;  %v1268_v44 = vld [vmem:[#allocation5 + $0xd0] sm:$0xf0]  ;;  %v1274_v45 = vld [vmem:[#allocation5 + $0x98] sm:$0xf]  ;;  %v1716_v47 = vld [vmem:[#allocation5 + $0x9c] sm:$0xf]  ;;  %v1267_v49 = vor.u32 %v1723_v41, %v1266_v40 }
  0x36   :  { %929 = vmatpush.bf16.msrb.mxu0 %v1587_v52  ;;  %943 = vmatpush.bf16.msrb.mxu1 %v1591_v53  ;;  %v1724_v46 = vld [vmem:[#allocation5 + $0xd4] sm:$0xf0]  ;;  %v1276_v48 = vld [vmem:[#allocation5 + $0xd8] sm:$0xf0]  ;;  %v1202_v50 = vld [vmem:[#allocation5 + $0x10] sm:$0xf]  ;;  %v1271_v52 = vor.u32 %v1715_v42, %v1268_v44 }
  0x37   :  { %957 = vmatpush.bf16.msrb.mxu2 %v1595_v54  ;;  %v1707_v51 = vld [vmem:[#allocation5 + $0x4c] sm:$0xf0]  ;;  %v1275_v53 = vor.u32 %v1724_v46, %v1274_v45  ;;  %v1699_v54 = vld [vmem:[#allocation5 + $0x14] sm:$0xf]  ;;  %v1210_v56 = vld [vmem:[#allocation5 + $0x18] sm:$0xf]  ;;  %v1279_v57 = vor.u32 %v1716_v47, %v1276_v48 }
  0x38   :  { %971 = vmatpush.bf16.msrb.mxu3 %v1599_v58  ;;  %v1204_v55 = vld [vmem:[#allocation5 + $0x50] sm:$0xf0]  ;;  %v1708_v58 = vld [vmem:[#allocation5 + $0x54] sm:$0xf0]  ;;  %v1700_v59 = vld [vmem:[#allocation5 + $0x1c] sm:$0xf] }
  0x39   :  { %v1212_v60 = vld [vmem:[#allocation5 + $0x58] sm:$0xf0]  ;;  %v1666_v61 = vld [vmem:[#allocation5 + $0x3a0] sm:$0xf]  ;;  %v1813_v63 = vld [vmem:[#allocation5 + $0x3a4] sm:$0xf]  ;;  %v1207_v5 = vor.u32 %v1699_v54, %v1204_v55  ;;  %v1211_v6 = vor.u32 %v1708_v58, %v1210_v56 }
  0x3a   :  { %930 = vmatpush.bf16.msrb.mxu0 %v1523_v0  ;;  %944 = vmatpush.bf16.msrb.mxu1 %v1527_v2  ;;  %v1821_v62 = vld [vmem:[#allocation5 + $0x3dc] sm:$0xf0]  ;;  %v1203_v0 = vor.u32 %v1707_v51, %v1202_v50  ;;  %v1668_v2 = vld [vmem:[#allocation5 + $0x3e0] sm:$0xf0]  ;;  %v1822_v4 = vld [vmem:[#allocation5 + $0x3e4] sm:$0xf0]  ;;  %v1215_v9 = vor.u32 %v1700_v59, %v1212_v60 }
  0x3b   :  { %958 = vmatpush.bf16.msrb.mxu2 %v1531_v3  ;;  %v1674_v3 = vld [vmem:[#allocation5 + $0x3a8] sm:$0xf]  ;;  %v1676_v8 = vld [vmem:[#allocation5 + $0x3e8] sm:$0xf0]  ;;  %v1667_v10 = vor.u32 %v1821_v62, %v1666_v61  ;;  %v1671_v11 = vor.u32 %v1813_v63, %v1668_v2  ;;  %v1604_v17 = vld [vmem:[#allocation5 + $0x360] sm:$0xf0] }
  0x3c   :  { %972 = vmatpush.bf16.msrb.mxu3 %v1535_v7  ;;  %v1814_v7 = vld [vmem:[#allocation5 + $0x3ac] sm:$0xf]  ;;  %v1675_v12 = vor.u32 %v1822_v4, %v1674_v3  ;;  %v1610_v18 = vld [vmem:[#allocation5 + $0x328] sm:$0xf]  ;;  %v1540_v29 = vld [vmem:[#allocation5 + $0x2e0] sm:$0xf0] }
  0x3d   :  { %v1679_v16 = vor.u32 %v1814_v7, %v1676_v8  ;;  %v1798_v20 = vld [vmem:[#allocation5 + $0x32c] sm:$0xf]  ;;  %v1546_v30 = vld [vmem:[#allocation5 + $0x2a8] sm:$0xf]  ;;  %v1476_v41 = vld [vmem:[#allocation5 + $0x260] sm:$0xf0] }
  0x3e   :  { %931 = vmatpush.bf16.msrb.mxu0 %v1459_v13  ;;  %945 = vmatpush.bf16.msrb.mxu1 %v1463_v14  ;;  %v1602_v13 = vld [vmem:[#allocation5 + $0x320] sm:$0xf]  ;;  %v1612_v21 = vld [vmem:[#allocation5 + $0x368] sm:$0xf0]  ;;  %v1482_v42 = vld [vmem:[#allocation5 + $0x228] sm:$0xf] }
  0x3f   :  { %959 = vmatpush.bf16.msrb.mxu2 %v1467_v15  ;;  %v1805_v14 = vld [vmem:[#allocation5 + $0x35c] sm:$0xf0]  ;;  %v1797_v15 = vld [vmem:[#allocation5 + $0x324] sm:$0xf]  ;;  %v1615_v28 = vor.u32 %v1798_v20, %v1612_v21  ;;  %v1782_v32 = vld [vmem:[#allocation5 + $0x2ac] sm:$0xf] }
  0x40   :  { %973 = vmatpush.bf16.msrb.mxu3 %v1471_v19  ;;  %v1806_v19 = vld [vmem:[#allocation5 + $0x364] sm:$0xf0]  ;;  %v1603_v22 = vor.u32 %v1805_v14, %v1602_v13  ;;  %v1607_v23 = vor.u32 %v1797_v15, %v1604_v17  ;;  %v1548_v33 = vld [vmem:[#allocation5 + $0x2e8] sm:$0xf0]  ;;  %v1757_v50 = vld [vmem:[#allocation5 + $0x1dc] sm:$0xf0] }
  0x41   :  { %v1611_v24 = vor.u32 %v1806_v19, %v1610_v18  ;;  %v1551_v40 = vor.u32 %v1782_v32, %v1548_v33  ;;  %v1766_v44 = vld [vmem:[#allocation5 + $0x22c] sm:$0xf]  ;;  %v1749_v51 = vld [vmem:[#allocation5 + $0x1a4] sm:$0xf]  ;;  %v1418_v54 = vld [vmem:[#allocation5 + $0x1a8] sm:$0xf] }
  0x42   :  { %932 = vmatpush.bf16.msrb.mxu0 %v1395_v25  ;;  %946 = vmatpush.bf16.msrb.mxu1 %v1399_v26  ;;  %v1538_v25 = vld [vmem:[#allocation5 + $0x2a0] sm:$0xf]  ;;  %v1484_v45 = vld [vmem:[#allocation5 + $0x268] sm:$0xf0]  ;;  %v1758_v55 = vld [vmem:[#allocation5 + $0x1e4] sm:$0xf0] }
  0x43   :  { %960 = vmatpush.bf16.msrb.mxu2 %v1403_v27  ;;  %v1789_v26 = vld [vmem:[#allocation5 + $0x2dc] sm:$0xf0]  ;;  %v1781_v27 = vld [vmem:[#allocation5 + $0x2a4] sm:$0xf]  ;;  %v1750_v56 = vld [vmem:[#allocation5 + $0x1ac] sm:$0xf]  ;;  %v1419_v60 = vor.u32 %v1758_v55, %v1418_v54 }
  0x44   :  { %974 = vmatpush.bf16.msrb.mxu3 %v1407_v31  ;;  %v1790_v31 = vld [vmem:[#allocation5 + $0x2e4] sm:$0xf0]  ;;  %v1539_v34 = vor.u32 %v1789_v26, %v1538_v25  ;;  %v1543_v35 = vor.u32 %v1781_v27, %v1540_v29  ;;  %v1346_v61 = vld [vmem:[#allocation5 + $0x120] sm:$0xf]  ;;  %v1733_v63 = vld [vmem:[#allocation5 + $0x124] sm:$0xf] }
  0x45   :  { %v1547_v36 = vor.u32 %v1790_v31, %v1546_v30  ;;  %v1741_v62 = vld [vmem:[#allocation5 + $0x15c] sm:$0xf0]  ;;  %v1348_v2 = vld [vmem:[#allocation5 + $0x160] sm:$0xf0]  ;;  %v1354_v3 = vld [vmem:[#allocation5 + $0x128] sm:$0xf] }
  0x46   :  { %933 = vmatpush.bf16.msrb.mxu0 %v1331_v37  ;;  %947 = vmatpush.bf16.msrb.mxu1 %v1335_v38  ;;  %v1474_v37 = vld [vmem:[#allocation5 + $0x220] sm:$0xf]  ;;  %v1742_v4 = vld [vmem:[#allocation5 + $0x164] sm:$0xf0]  ;;  %v1347_v7 = vor.u32 %v1741_v62, %v1346_v61  ;;  %v1351_v8 = vor.u32 %v1733_v63, %v1348_v2  ;;  %v1284_v14 = vld [vmem:[#allocation5 + $0xe0] sm:$0xf0] }
  0x47   :  { %961 = vmatpush.bf16.msrb.mxu2 %v1339_v39  ;;  %v1773_v38 = vld [vmem:[#allocation5 + $0x25c] sm:$0xf0]  ;;  %v1765_v39 = vld [vmem:[#allocation5 + $0x224] sm:$0xf]  ;;  %v1290_v15 = vld [vmem:[#allocation5 + $0xa8] sm:$0xf] }
  0x48   :  { %975 = vmatpush.bf16.msrb.mxu3 %v1343_v43  ;;  %v1774_v43 = vld [vmem:[#allocation5 + $0x264] sm:$0xf0]  ;;  %v1475_v46 = vor.u32 %v1773_v38, %v1474_v37  ;;  %v1479_v47 = vor.u32 %v1765_v39, %v1476_v41  ;;  %v1718_v17 = vld [vmem:[#allocation5 + $0xac] sm:$0xf]  ;;  %v1218_v20 = vld [vmem:[#allocation5 + $0x20] sm:$0xf] }
  0x49   :  { %v1483_v48 = vor.u32 %v1774_v43, %v1482_v42  ;;  %v1292_v18 = vld [vmem:[#allocation5 + $0xe8] sm:$0xf0]  ;;  %v1709_v21 = vld [vmem:[#allocation5 + $0x5c] sm:$0xf0]  ;;  %v1220_v25 = vld [vmem:[#allocation5 + $0x60] sm:$0xf0] }
  0x4a   :  { %934 = vmatpush.bf16.msrb.mxu0 %v1267_v49  ;;  %948 = vmatpush.bf16.msrb.mxu1 %v1271_v52  ;;  %v1410_v49 = vld [vmem:[#allocation5 + $0x1a0] sm:$0xf]  ;;  %v1487_v52 = vor.u32 %v1766_v44, %v1484_v45  ;;  %v1226_v26 = vld [vmem:[#allocation5 + $0x28] sm:$0xf]  ;;  %v1295_v27 = vor.u32 %v1718_v17, %v1292_v18  ;;  %v1702_v29 = vld [vmem:[#allocation5 + $0x2c] sm:$0xf] }
  0x4b   :  { %962 = vmatpush.bf16.msrb.mxu2 %v1275_v53  ;;  %v1412_v53 = vld [vmem:[#allocation5 + $0x1e0] sm:$0xf0]  ;;  %v1411_v58 = vor.u32 %v1757_v50, %v1410_v49  ;;  %v1228_v30 = vld [vmem:[#allocation5 + $0x68] sm:$0xf0]  ;;  %v1682_v31 = vld [vmem:[#allocation5 + $0x3b0] sm:$0xf] }
  0x4c   :  { %976 = vmatpush.bf16.msrb.mxu3 %v1279_v57  ;;  %v1420_v57 = vld [vmem:[#allocation5 + $0x1e8] sm:$0xf0]  ;;  %v1415_v59 = vor.u32 %v1749_v51, %v1412_v53  ;;  %v1823_v32 = vld [vmem:[#allocation5 + $0x3ec] sm:$0xf0]  ;;  %v1815_v33 = vld [vmem:[#allocation5 + $0x3b4] sm:$0xf]  ;;  %v1231_v42 = vor.u32 %v1702_v29, %v1228_v30 }
  0x4d   :  { %v1824_v37 = vld [vmem:[#allocation5 + $0x3f4] sm:$0xf0]  ;;  %v1692_v41 = vld [vmem:[#allocation5 + $0x3f8] sm:$0xf0]  ;;  %v1683_v43 = vor.u32 %v1823_v32, %v1682_v31  ;;  %v1620_v50 = vld [vmem:[#allocation5 + $0x370] sm:$0xf0] }
  0x4e   :  { %935 = vmatpush.bf16.msrb.mxu0 %v1203_v0  ;;  %949 = vmatpush.bf16.msrb.mxu1 %v1207_v5  ;;  %v1423_v0 = vor.u32 %v1750_v56, %v1420_v57  ;;  %v1734_v5 = vld [vmem:[#allocation5 + $0x12c] sm:$0xf]  ;;  %v1626_v51 = vld [vmem:[#allocation5 + $0x338] sm:$0xf]  ;;  %v1800_v53 = vld [vmem:[#allocation5 + $0x33c] sm:$0xf] }
  0x4f   :  { %963 = vmatpush.bf16.msrb.mxu2 %v1211_v6  ;;  %v1356_v6 = vld [vmem:[#allocation5 + $0x168] sm:$0xf0]  ;;  %v1628_v54 = vld [vmem:[#allocation5 + $0x378] sm:$0xf0]  ;;  %v1556_v62 = vld [vmem:[#allocation5 + $0x2f0] sm:$0xf0] }
  0x50   :  { %977 = vmatpush.bf16.msrb.mxu3 %v1215_v9  ;;  %v1355_v9 = vor.u32 %v1742_v4, %v1354_v3  ;;  %v1359_v13 = vor.u32 %v1734_v5, %v1356_v6  ;;  %v1631_v61 = vor.u32 %v1800_v53, %v1628_v54  ;;  %v1562_v63 = vld [vmem:[#allocation5 + $0x2b8] sm:$0xf]  ;;  %v1784_v2 = vld [vmem:[#allocation5 + $0x2bc] sm:$0xf]  ;;  %v1362_v31 = vld [vmem:[#allocation5 + $0x130] sm:$0xf] }
  0x51   :  { %936 = vmatmul.bf16.vlgmr.msrb.gmra.mxu0 %v1975_v1  ;;  %950 = vmatmul.bf16.vlgmr.msrb.gmra.mxu1 %v1975_v1  ;;  %v1564_v3 = vld [vmem:[#allocation5 + $0x2f8] sm:$0xf0]  ;;  %v1743_v32 = vld [vmem:[#allocation5 + $0x16c] sm:$0xf0]  ;;  %s1164_s28 = sshll.u32 %s1940_s2, 4  ;;  %s1166_s4 = sshll.u32 %s2022_s3, 4  ;;  %s1165_s28 = int_to_ptr.vmem [resolvable:$true] %s1164_s28  ;;  %s1167_s4 = int_to_ptr.hbm [resolvable:$true] %s1166_s4 }
  0x52   :  { %984 = vmatpush.bf16.msra.mxu0 %v1667_v10  ;;  %998 = vmatpush.bf16.msra.mxu1 %v1671_v11  ;;  %v1282_v10 = vld [vmem:[#allocation5 + $0xa0] sm:$0xf] }
  0x53   :  { %1012 = vmatpush.bf16.msra.mxu2 %v1675_v12  ;;  %978 = vmatmul.bf16.vlgmr.msrb.gmra.mxu3 %v1975_v1  ;;  %v1725_v11 = vld [vmem:[#allocation5 + $0xdc] sm:$0xf0]  ;;  %v1717_v12 = vld [vmem:[#allocation5 + $0xa4] sm:$0xf] }
  0x54   :  { %1026 = vmatpush.bf16.msra.mxu3 %v1679_v16  ;;  %964 = vmatmul.bf16.vlgmr.msrb.gmra.mxu2 %v1975_v1  ;;  %v1726_v16 = vld [vmem:[#allocation5 + $0xe4] sm:$0xf0]  ;;  %v1283_v19 = vor.u32 %v1725_v11, %v1282_v10  ;;  %v1567_v10 = vor.u32 %v1784_v2, %v1564_v3  ;;  %v1492_v11 = vld [vmem:[#allocation5 + $0x270] sm:$0xf0] }
  0x56   :  { %985 = vmatpush.bf16.msra.mxu0 %v1603_v22  ;;  %999 = vmatpush.bf16.msra.mxu1 %v1607_v23  ;;  %v1287_v22 = vor.u32 %v1717_v12, %v1284_v14  ;;  %v1291_v23 = vor.u32 %v1726_v16, %v1290_v15  ;;  %v1498_v12 = vld [vmem:[#allocation5 + $0x238] sm:$0xf]  ;;  %v1768_v14 = vld [vmem:[#allocation5 + $0x23c] sm:$0xf] }
  0x57   :  { %1013 = vmatpush.bf16.msra.mxu2 %v1611_v24  ;;  %v1701_v24 = vld [vmem:[#allocation5 + $0x24] sm:$0xf]  ;;  %v1500_v15 = vld [vmem:[#allocation5 + $0x278] sm:$0xf0] }
  0x58   :  { %1027 = vmatpush.bf16.msra.mxu3 %v1615_v28  ;;  %v1710_v28 = vld [vmem:[#allocation5 + $0x64] sm:$0xf0]  ;;  %v1223_v38 = vor.u32 %v1701_v24, %v1220_v25  ;;  %v1434_v24 = vld [vmem:[#allocation5 + $0x1b8] sm:$0xf] }
  0x59   :  { %v1227_v39 = vor.u32 %v1710_v28, %v1226_v26  ;;  %v1760_v25 = vld [vmem:[#allocation5 + $0x1f4] sm:$0xf0]  ;;  %v1752_v26 = vld [vmem:[#allocation5 + $0x1bc] sm:$0xf] }
  0x5a   :  { %986 = vmatpush.bf16.msra.mxu0 %v1539_v34  ;;  %1000 = vmatpush.bf16.msra.mxu1 %v1543_v35  ;;  %v1219_v34 = vor.u32 %v1709_v21, %v1218_v20  ;;  %v1684_v35 = vld [vmem:[#allocation5 + $0x3f0] sm:$0xf0]  ;;  %v1759_v20 = vld [vmem:[#allocation5 + $0x1ec] sm:$0xf0]  ;;  %v1435_v30 = vor.u32 %v1760_v25, %v1434_v24 }
  0x5b   :  { %1014 = vmatpush.bf16.msra.mxu2 %v1547_v36  ;;  %v1690_v36 = vld [vmem:[#allocation5 + $0x3b8] sm:$0xf]  ;;  %v1687_v44 = vor.u32 %v1815_v33, %v1684_v35  ;;  %v1751_v21 = vld [vmem:[#allocation5 + $0x1b4] sm:$0xf] }
  0x5c   :  { %1028 = vmatpush.bf16.msra.mxu3 %v1551_v40  ;;  %v1816_v40 = vld [vmem:[#allocation5 + $0x3bc] sm:$0xf]  ;;  %v1691_v45 = vor.u32 %v1824_v37, %v1690_v36  ;;  %v1735_v33 = vld [vmem:[#allocation5 + $0x134] sm:$0xf]  ;;  %v1370_v36 = vld [vmem:[#allocation5 + $0x138] sm:$0xf] }
  0x5d   :  { %v1695_v49 = vor.u32 %v1816_v40, %v1692_v41  ;;  %v1364_v35 = vld [vmem:[#allocation5 + $0x170] sm:$0xf0]  ;;  %v1744_v37 = vld [vmem:[#allocation5 + $0x174] sm:$0xf0]  ;;  %v1363_v40 = vor.u32 %v1743_v32, %v1362_v31 }
  0x5e   :  { %987 = vmatpush.bf16.msra.mxu0 %v1475_v46  ;;  %1001 = vmatpush.bf16.msra.mxu1 %v1479_v47  ;;  %v1618_v46 = vld [vmem:[#allocation5 + $0x330] sm:$0xf]  ;;  %v1367_v41 = vor.u32 %v1735_v33, %v1364_v35 }
  0x5f   :  { %1015 = vmatpush.bf16.msra.mxu2 %v1483_v48  ;;  %v1807_v47 = vld [vmem:[#allocation5 + $0x36c] sm:$0xf0]  ;;  %v1799_v48 = vld [vmem:[#allocation5 + $0x334] sm:$0xf] }
  0x60   :  { %1029 = vmatpush.bf16.msra.mxu3 %v1487_v52  ;;  %v1808_v52 = vld [vmem:[#allocation5 + $0x374] sm:$0xf0]  ;;  %v1619_v55 = vor.u32 %v1807_v47, %v1618_v46  ;;  %v1623_v56 = vor.u32 %v1799_v48, %v1620_v50  ;;  %v1300_v47 = vld [vmem:[#allocation5 + $0xf0] sm:$0xf0]  ;;  %v1720_v50 = vld [vmem:[#allocation5 + $0xbc] sm:$0xf] }
  0x61   :  { %v1627_v57 = vor.u32 %v1808_v52, %v1626_v51  ;;  %v1306_v48 = vld [vmem:[#allocation5 + $0xb8] sm:$0xf]  ;;  %v1308_v51 = vld [vmem:[#allocation5 + $0xf8] sm:$0xf0] }
  0x62   :  { %988 = vmatpush.bf16.msra.mxu0 %v1411_v58  ;;  %1002 = vmatpush.bf16.msra.mxu1 %v1415_v59  ;;  %v1554_v58 = vld [vmem:[#allocation5 + $0x2b0] sm:$0xf] }
  0x63   :  { %1016 = vmatpush.bf16.msra.mxu2 %v1419_v60  ;;  %v1791_v59 = vld [vmem:[#allocation5 + $0x2ec] sm:$0xf0]  ;;  %v1783_v60 = vld [vmem:[#allocation5 + $0x2b4] sm:$0xf] }
  0x64   :  { %1030 = vmatpush.bf16.msra.mxu3 %v1423_v0  ;;  %v1792_v0 = vld [vmem:[#allocation5 + $0x2f4] sm:$0xf0]  ;;  %v1555_v4 = vor.u32 %v1791_v59, %v1554_v58  ;;  %v1559_v5 = vor.u32 %v1783_v60, %v1556_v62  ;;  %v1311_v58 = vor.u32 %v1720_v50, %v1308_v51  ;;  %v1236_v59 = vld [vmem:[#allocation5 + $0x70] sm:$0xf0]  ;;  %v1704_v62 = vld [vmem:[#allocation5 + $0x3c] sm:$0xf] }
  0x65   :  { %v1563_v6 = vor.u32 %v1792_v0, %v1562_v63  ;;  %v1242_v60 = vld [vmem:[#allocation5 + $0x38] sm:$0xf]  ;;  %v1244_v63 = vld [vmem:[#allocation5 + $0x78] sm:$0xf0] }
  0x66   :  { %989 = vmatpush.bf16.msra.mxu0 %v1347_v7  ;;  %1003 = vmatpush.bf16.msra.mxu1 %v1351_v8  ;;  %v1490_v7 = vld [vmem:[#allocation5 + $0x230] sm:$0xf] }
  0x67   :  { %1017 = vmatpush.bf16.msra.mxu2 %v1355_v9  ;;  %v1775_v8 = vld [vmem:[#allocation5 + $0x26c] sm:$0xf0]  ;;  %v1767_v9 = vld [vmem:[#allocation5 + $0x234] sm:$0xf] }
  0x68   :  { %1031 = vmatpush.bf16.msra.mxu3 %v1359_v13  ;;  %v1776_v13 = vld [vmem:[#allocation5 + $0x274] sm:$0xf0]  ;;  %v1491_v16 = vor.u32 %v1775_v8, %v1490_v7  ;;  %v1495_v17 = vor.u32 %v1767_v9, %v1492_v11 }
  0x69   :  { %v1499_v18 = vor.u32 %v1776_v13, %v1498_v12 }
  0x6a   :  { %990 = vmatpush.bf16.msra.mxu0 %v1283_v19  ;;  %1004 = vmatpush.bf16.msra.mxu1 %v1287_v22  ;;  %v1426_v19 = vld [vmem:[#allocation5 + $0x1b0] sm:$0xf]  ;;  %v1503_v22 = vor.u32 %v1768_v14, %v1500_v15 }
  0x6b   :  { %1018 = vmatpush.bf16.msra.mxu2 %v1291_v23  ;;  %v1428_v23 = vld [vmem:[#allocation5 + $0x1f0] sm:$0xf0]  ;;  %v1427_v28 = vor.u32 %v1759_v20, %v1426_v19 }
  0x6c   :  { %1032 = vmatpush.bf16.msra.mxu3 %v1295_v27  ;;  %v1436_v27 = vld [vmem:[#allocation5 + $0x1f8] sm:$0xf0]  ;;  %v1431_v29 = vor.u32 %v1751_v21, %v1428_v23 }
  0x6e   :  { %991 = vmatpush.bf16.msra.mxu0 %v1219_v34  ;;  %1005 = vmatpush.bf16.msra.mxu1 %v1223_v38  ;;  %v1439_v34 = vor.u32 %v1752_v26, %v1436_v27  ;;  %v1736_v38 = vld [vmem:[#allocation5 + $0x13c] sm:$0xf] }
  0x6f   :  { %1019 = vmatpush.bf16.msra.mxu2 %v1227_v39  ;;  %v1372_v39 = vld [vmem:[#allocation5 + $0x178] sm:$0xf0] }
  0x70   :  { %1033 = vmatpush.bf16.msra.mxu3 %v1231_v42  ;;  %v1371_v42 = vor.u32 %v1744_v37, %v1370_v36  ;;  %v1375_v46 = vor.u32 %v1736_v38, %v1372_v39 }
  0x71   :  { %992 = vmatmul.bf16.vlgmr.msra.gmra.mxu0 %v1975_v1  ;;  %1006 = vmatmul.bf16.vlgmr.msra.gmra.mxu1 %v1975_v1 }
  0x72   :  { %1040 = vmatpush.bf16.msrb.mxu0 %v1683_v43  ;;  %1054 = vmatpush.bf16.msrb.mxu1 %v1687_v44  ;;  %v1298_v43 = vld [vmem:[#allocation5 + $0xb0] sm:$0xf] }
  0x73   :  { %1068 = vmatpush.bf16.msrb.mxu2 %v1691_v45  ;;  %1034 = vmatmul.bf16.vlgmr.msra.gmra.mxu3 %v1975_v1  ;;  %v1727_v44 = vld [vmem:[#allocation5 + $0xec] sm:$0xf0]  ;;  %v1719_v45 = vld [vmem:[#allocation5 + $0xb4] sm:$0xf] }
  0x74   :  { %1082 = vmatpush.bf16.msrb.mxu3 %v1695_v49  ;;  %1020 = vmatmul.bf16.vlgmr.msra.gmra.mxu2 %v1975_v1  ;;  %v1728_v49 = vld [vmem:[#allocation5 + $0xf4] sm:$0xf0]  ;;  %v1299_v52 = vor.u32 %v1727_v44, %v1298_v43  ;;  %v1303_v53 = vor.u32 %v1719_v45, %v1300_v47 }
  0x75   :  { %v1307_v54 = vor.u32 %v1728_v49, %v1306_v48 }
  0x76   :  { %1041 = vmatpush.bf16.msrb.mxu0 %v1619_v55  ;;  %1055 = vmatpush.bf16.msrb.mxu1 %v1623_v56  ;;  %v1234_v55 = vld [vmem:[#allocation5 + $0x30] sm:$0xf] }
  0x77   :  { %1069 = vmatpush.bf16.msrb.mxu2 %v1627_v57  ;;  %v1711_v56 = vld [vmem:[#allocation5 + $0x6c] sm:$0xf0]  ;;  %v1703_v57 = vld [vmem:[#allocation5 + $0x34] sm:$0xf] }
  0x78   :  { %1083 = vmatpush.bf16.msrb.mxu3 %v1631_v61  ;;  %v1712_v61 = vld [vmem:[#allocation5 + $0x74] sm:$0xf0]  ;;  %v1235_v0 = vor.u32 %v1711_v56, %v1234_v55  ;;  %v1239_v2 = vor.u32 %v1703_v57, %v1236_v59 }
  0x79   :  { %v1243_v3 = vor.u32 %v1712_v61, %v1242_v60 }
  0x7a   :  { %1042 = vmatpush.bf16.msrb.mxu0 %v1555_v4  ;;  %1056 = vmatpush.bf16.msrb.mxu1 %v1559_v5  ;;  %v1247_v4 = vor.u32 %v1704_v62, %v1244_v63  ;;  %v1993_v5 = vld [vmem:[#allocation7] sm:$0xff] }
  0x7b   :  { %1070 = vmatpush.bf16.msrb.mxu2 %v1563_v6  ;;  %v194_v6 = vperm.slane %v1993_v5, 0  ;;  %v195_v7 = vperm.slane %v1993_v5, 1  ;;  %v196_v12 = vperm.slane %v1993_v5, 2  ;;  %v197_v14 = vperm.slane %v1993_v5, 3 }
  0x7c   :  { %1084 = vmatpush.bf16.msrb.mxu3 %v1567_v10  ;;  %v198_v37 = vperm.slane %v1993_v5, 4  ;;  %v199_v38 = vperm.slane %v1993_v5, 5  ;;  %v200_v43 = vperm.slane %v1993_v5, 6  ;;  %v201_v45 = vperm.slane %v1993_v5, 7 }
  0x7e   :  { %1043 = vmatpush.bf16.msrb.mxu0 %v1491_v16  ;;  %1057 = vmatpush.bf16.msrb.mxu1 %v1495_v17 }
  0x7f   :  { %1071 = vmatpush.bf16.msrb.mxu2 %v1499_v18 }
  0x80   :  { %1085 = vmatpush.bf16.msrb.mxu3 %v1503_v22 }
  0x82   :  { %1044 = vmatpush.bf16.msrb.mxu0 %v1427_v28  ;;  %1058 = vmatpush.bf16.msrb.mxu1 %v1431_v29 }
  0x83   :  { %1072 = vmatpush.bf16.msrb.mxu2 %v1435_v30 }
  0x84   :  { %1086 = vmatpush.bf16.msrb.mxu3 %v1439_v34 }
  0x86   :  { %1045 = vmatpush.bf16.msrb.mxu0 %v1363_v40  ;;  %1059 = vmatpush.bf16.msrb.mxu1 %v1367_v41 }
  0x87   :  { %1073 = vmatpush.bf16.msrb.mxu2 %v1371_v42 }
  0x88   :  { %1087 = vmatpush.bf16.msrb.mxu3 %v1375_v46 }
  0x8a   :  { %1046 = vmatpush.bf16.msrb.mxu0 %v1299_v52  ;;  %1060 = vmatpush.bf16.msrb.mxu1 %v1303_v53 }
  0x8b   :  { %1074 = vmatpush.bf16.msrb.mxu2 %v1307_v54 }
  0x8c   :  { %1088 = vmatpush.bf16.msrb.mxu3 %v1311_v58 }
  0x8e   :  { %1047 = vmatpush.bf16.msrb.mxu0 %v1235_v0  ;;  %1061 = vmatpush.bf16.msrb.mxu1 %v1239_v2 }
  0x8f   :  { %1075 = vmatpush.bf16.msrb.mxu2 %v1243_v3 }
  0x90   :  { %1089 = vmatpush.bf16.msrb.mxu3 %v1247_v4 }
  0x91   :  { %1048 = vmatmul.bf16.vlgmr.msrb.gmra.mxu0 %v1975_v1  ;;  %1062 = vmatmul.bf16.vlgmr.msrb.gmra.mxu1 %v1975_v1 }
  0x92   :  { %1076 = vmatmul.bf16.vlgmr.msrb.gmra.mxu2 %v1975_v1 }
  0x93   :  { %1090 = vmatmul.bf16.vlgmr.msrb.gmra.mxu3 %v1975_v1 }
  0xae   :  { %v881_v8 = vpop.f32.mrf.mxu0  ;;  %v895_v10 = vpop.f32.mrf.mxu1 }
  0xaf   :  { %v882_v9 = vadd.f32 %v881_v8, %v194_v6  ;;  %v896_v11 = vadd.f32 %v895_v10, %v195_v7 }
  0xb1   :  { %v1096_v13 = vmax.f32 %v882_v9, 0.0  ;;  %v1097_v15 = vmax.f32 %v896_v11, 0.0 }
  0xb3   :  { %v1128_v17 = vpack.c.bf16 %v1097_v15, %v1096_v13 }
  0xb5   :  { %1144 = vst [vmem:[#allocation8] sm:$0xff] %v1128_v17 }
  0xb6   :  { %v923_v1 = vpop.f32.mrf.mxu3  ;;  %v883_v21 = vpop.f32.mrf.mxu0 }
  0xb7   :  { %v909_v16 = vpop.f32.mrf.mxu2  ;;  %v924_v19 = vadd.f32 %v923_v1, %v197_v14  ;;  %v884_v23 = vadd.f32 %v883_v21, %v194_v6  ;;  %v897_v24 = vpop.f32.mrf.mxu1  ;;  %v2003_v6 = vld [vmem:[#allocation7 + $0x8] sm:$0xff] }
  0xb8   :  { %v910_v18 = vadd.f32 %v909_v16, %v196_v12  ;;  %v898_v25 = vadd.f32 %v897_v24, %v195_v7  ;;  %v202_v7 = vperm.slane %v2003_v6, 0  ;;  %v203_v8 = vperm.slane %v2003_v6, 1 }
  0xb9   :  { %v1099_v22 = vmax.f32 %v924_v19, 0.0  ;;  %v1112_v27 = vmax.f32 %v884_v23, 0.0  ;;  %v204_v13 = vperm.slane %v2003_v6, 2  ;;  %v205_v15 = vperm.slane %v2003_v6, 3 }
  0xba   :  { %v1098_v20 = vmax.f32 %v910_v18, 0.0  ;;  %v1113_v28 = vmax.f32 %v898_v25, 0.0 }
  0xbc   :  { %v1129_v26 = vpack.c.bf16 %v1099_v22, %v1098_v20  ;;  %v1136_v30 = vpack.c.bf16 %v1113_v28, %v1112_v27 }
  0xbe   :  { %1145 = vst [vmem:[#allocation8 + $0x8] sm:$0xff] %v1129_v26  ;;  %v925_v32 = vpop.f32.mrf.mxu3 }
  0xbf   :  { %v911_v29 = vpop.f32.mrf.mxu2  ;;  %v926_v33 = vadd.f32 %v925_v32, %v197_v14  ;;  %1152 = vst [vmem:[#allocation8 + $0x40] sm:$0xff] %v1136_v30 }
  0xc0   :  { %v912_v31 = vadd.f32 %v911_v29, %v196_v12 }
  0xc1   :  { %v1115_v35 = vmax.f32 %v926_v33, 0.0 }
  0xc2   :  { %v1114_v34 = vmax.f32 %v912_v31, 0.0 }
  0xc4   :  { %v1137_v36 = vpack.c.bf16 %v1115_v35, %v1114_v34 }
  0xc6   :  { %1153 = vst [vmem:[#allocation8 + $0x48] sm:$0xff] %v1137_v36 }
  0xce   :  { %v937_v39 = vpop.f32.mrf.mxu0  ;;  %v951_v41 = vpop.f32.mrf.mxu1 }
  0xcf   :  { %v938_v40 = vadd.f32 %v937_v39, %v198_v37  ;;  %v952_v42 = vadd.f32 %v951_v41, %v199_v38  ;;  %v207_v39 = vperm.slane %v2003_v6, 5 }
  0xd1   :  { %v1100_v44 = vmax.f32 %v938_v40, 0.0  ;;  %v1101_v46 = vmax.f32 %v952_v42, 0.0 }
  0xd3   :  { %v1130_v48 = vpack.c.bf16 %v1101_v46, %v1100_v44  ;;  %v208_v46 = vperm.slane %v2003_v6, 6 }
  0xd5   :  { %1146 = vst [vmem:[#allocation8 + $0x10] sm:$0xff] %v1130_v48 }
  0xd6   :  { %v979_v50 = vpop.f32.mrf.mxu3  ;;  %v939_v53 = vpop.f32.mrf.mxu0 }
  0xd7   :  { %v965_v47 = vpop.f32.mrf.mxu2  ;;  %v980_v51 = vadd.f32 %v979_v50, %v201_v45  ;;  %v940_v55 = vadd.f32 %v939_v53, %v198_v37  ;;  %v953_v56 = vpop.f32.mrf.mxu1 }
  0xd8   :  { %v966_v49 = vadd.f32 %v965_v47, %v200_v43  ;;  %v954_v57 = vadd.f32 %v953_v56, %v199_v38  ;;  %v206_v38 = vperm.slane %v2003_v6, 4  ;;  %v209_v47 = vperm.slane %v2003_v6, 7 }
  0xd9   :  { %v1103_v54 = vmax.f32 %v980_v51, 0.0  ;;  %v1116_v59 = vmax.f32 %v940_v55, 0.0 }
  0xda   :  { %v1102_v52 = vmax.f32 %v966_v49, 0.0  ;;  %v1117_v60 = vmax.f32 %v954_v57, 0.0 }
  0xdc   :  { %v1131_v58 = vpack.c.bf16 %v1103_v54, %v1102_v52  ;;  %v1138_v62 = vpack.c.bf16 %v1117_v60, %v1116_v59 }
  0xde   :  { %1147 = vst [vmem:[#allocation8 + $0x18] sm:$0xff] %v1131_v58  ;;  %v981_v0 = vpop.f32.mrf.mxu3 }
  0xdf   :  { %v967_v61 = vpop.f32.mrf.mxu2  ;;  %v982_v2 = vadd.f32 %v981_v0, %v201_v45  ;;  %1154 = vst [vmem:[#allocation8 + $0x50] sm:$0xff] %v1138_v62 }
  0xe0   :  { %v968_v63 = vadd.f32 %v967_v61, %v200_v43 }
  0xe1   :  { %v1119_v4 = vmax.f32 %v982_v2, 0.0 }
  0xe2   :  { %v1118_v3 = vmax.f32 %v968_v63, 0.0 }
  0xe4   :  { %v1139_v5 = vpack.c.bf16 %v1119_v4, %v1118_v3 }
  0xe6   :  { %1155 = vst [vmem:[#allocation8 + $0x58] sm:$0xff] %v1139_v5 }
  0xee   :  { %v993_v9 = vpop.f32.mrf.mxu0  ;;  %v1007_v11 = vpop.f32.mrf.mxu1 }
  0xef   :  { %v994_v10 = vadd.f32 %v993_v9, %v202_v7  ;;  %v1008_v12 = vadd.f32 %v1007_v11, %v203_v8 }
  0xf1   :  { %v1104_v14 = vmax.f32 %v994_v10, 0.0  ;;  %v1105_v16 = vmax.f32 %v1008_v12, 0.0 }
  0xf3   :  { %v1132_v18 = vpack.c.bf16 %v1105_v16, %v1104_v14 }
  0xf5   :  { %1148 = vst [vmem:[#allocation8 + $0x20] sm:$0xff] %v1132_v18 }
  0xf6   :  { %v1035_v19 = vpop.f32.mrf.mxu3  ;;  %v995_v22 = vpop.f32.mrf.mxu0 }
  0xf7   :  { %v1021_v17 = vpop.f32.mrf.mxu2  ;;  %v1036_v20 = vadd.f32 %v1035_v19, %v205_v15  ;;  %v996_v24 = vadd.f32 %v995_v22, %v202_v7  ;;  %v1009_v25 = vpop.f32.mrf.mxu1 }
  0xf8   :  { %v1022_v1 = vadd.f32 %v1021_v17, %v204_v13  ;;  %v1010_v26 = vadd.f32 %v1009_v25, %v203_v8 }
  0xf9   :  { %v1107_v23 = vmax.f32 %v1036_v20, 0.0  ;;  %v1120_v28 = vmax.f32 %v996_v24, 0.0 }
  0xfa   :  { %v1106_v21 = vmax.f32 %v1022_v1, 0.0  ;;  %v1121_v29 = vmax.f32 %v1010_v26, 0.0 }
  0xfc   :  { %v1133_v27 = vpack.c.bf16 %v1107_v23, %v1106_v21  ;;  %v1140_v31 = vpack.c.bf16 %v1121_v29, %v1120_v28 }
  0xfe   :  { %1149 = vst [vmem:[#allocation8 + $0x28] sm:$0xff] %v1133_v27  ;;  %v1037_v33 = vpop.f32.mrf.mxu3 }
  0xff   :  { %v1023_v30 = vpop.f32.mrf.mxu2  ;;  %v1038_v34 = vadd.f32 %v1037_v33, %v205_v15  ;;  %1156 = vst [vmem:[#allocation8 + $0x60] sm:$0xff] %v1140_v31 }
 0x100   :  { %v1024_v32 = vadd.f32 %v1023_v30, %v204_v13 }
 0x101   :  { %v1123_v36 = vmax.f32 %v1038_v34, 0.0 }
 0x102   :  { %v1122_v35 = vmax.f32 %v1024_v32, 0.0 }
 0x104   :  { %v1141_v37 = vpack.c.bf16 %v1123_v36, %v1122_v35 }
 0x106   :  { %1157 = vst [vmem:[#allocation8 + $0x68] sm:$0xff] %v1141_v37 }
 0x10e   :  { %v1049_v40 = vpop.f32.mrf.mxu0  ;;  %v1063_v42 = vpop.f32.mrf.mxu1 }
 0x10f   :  { %v1050_v41 = vadd.f32 %v1049_v40, %v206_v38  ;;  %v1064_v43 = vadd.f32 %v1063_v42, %v207_v39 }
 0x111   :  { %v1108_v44 = vmax.f32 %v1050_v41, 0.0  ;;  %v1109_v45 = vmax.f32 %v1064_v43, 0.0 }
 0x113   :  { %v1134_v48 = vpack.c.bf16 %v1109_v45, %v1108_v44 }
 0x115   :  { %v1077_v49 = vpop.f32.mrf.mxu2  ;;  %1150 = vst [vmem:[#allocation8 + $0x30] sm:$0xff] %v1134_v48 }
 0x116   :  { %v1078_v50 = vadd.f32 %v1077_v49, %v208_v46  ;;  %v1091_v51 = vpop.f32.mrf.mxu3  ;;  %v1051_v52 = vpop.f32.mrf.mxu0 }
 0x117   :  { %v1092_v53 = vadd.f32 %v1091_v51, %v209_v47  ;;  %v1052_v54 = vadd.f32 %v1051_v52, %v206_v38  ;;  %v1065_v55 = vpop.f32.mrf.mxu1 }
 0x118   :  { %v1110_v56 = vmax.f32 %v1078_v50, 0.0  ;;  %v1066_v57 = vadd.f32 %v1065_v55, %v207_v39 }
 0x119   :  { %v1111_v58 = vmax.f32 %v1092_v53, 0.0  ;;  %v1124_v59 = vmax.f32 %v1052_v54, 0.0 }
 0x11a   :  { %v1125_v60 = vmax.f32 %v1066_v57, 0.0 }
 0x11b   :  { %v1135_v61 = vpack.c.bf16 %v1111_v58, %v1110_v56 }
 0x11c   :  { %v1142_v62 = vpack.c.bf16 %v1125_v60, %v1124_v59 }
 0x11d   :  { %1151 = vst [vmem:[#allocation8 + $0x38] sm:$0xff] %v1135_v61  ;;  %v1079_v63 = vpop.f32.mrf.mxu2 }
 0x11e   :  { %1158 = vst [vmem:[#allocation8 + $0x70] sm:$0xff] %v1142_v62  ;;  %v1080_v0 = vadd.f32 %v1079_v63, %v208_v46  ;;  %v1093_v2 = vpop.f32.mrf.mxu3 }
 0x11f   :  { %v1094_v3 = vadd.f32 %v1093_v2, %v209_v47 }
 0x120   :  { %v1126_v4 = vmax.f32 %v1080_v0, 0.0 }
 0x121   :  { %v1127_v5 = vmax.f32 %v1094_v3, 0.0 }
 0x123   :  { %v1143_v6 = vpack.c.bf16 %v1127_v5, %v1126_v4 }
 0x125   :  { %1159 = vst [vmem:[#allocation8 + $0x78] sm:$0xff] %v1143_v6 }
 0x126   :  { %1172 = dma.vmem_to_hbm [thread:$0]  %s1165_s28, 2048, %s1167_s4, [#allocation4], %s1935_s20, %s1935_s20, %s1936_s21  }
 0x127   :  { %1932 = dma.done.wait [#allocation4], 2048  }
 0x128   :  { %1933 = vsyncadd [#allocation4], 4294965248 }
 0x129   :  { %1177 = vsyncpa [#allocation3], 1 }
 0x12a   :  { %1178 = vsyncpa [#allocation6], 1 }
 0x12b   :  { %1179 = vsyncpa [#allocation4], 1 }

</bundles_post_ra>
